<compile_context>
chip_gen: v5e
topology: v5e:2x2
jax: 0.10.0
libtpu: 0.0.40
codegen_flags: <defaults>
</compile_context>

<pallas_src>
import math

import jax
import jax.numpy as jnp
from jax import lax
from jax.experimental import pallas as pl
from jax.experimental.pallas import tpu as pltpu


def _vmem_capacity_bytes():
    try:
        info = pltpu.get_tpu_info()
        cap = getattr(info, "vmem_capacity_bytes", None)
        if cap:
            return int(cap)
    except Exception:
        pass
    return 64 << 20  # conservative default (v7x per-TensorCore VMEM)


def conv_ref(x, weight, bias):
    """XLA reference / fallback: Conv2d(C, Cout, 3, stride=2, padding=1) + bias."""
    out = lax.conv_general_dilated(
        x, weight, window_strides=(2, 2), padding=((1, 1), (1, 1)),
        dimension_numbers=("NCHW", "OIHW", "NCHW"))
    return out + bias.reshape(1, -1, 1, 1)


def _make_downsample_kernel(Ho, Wo, tci, multi_k):
    """Fused stride-2 3x3 conv kernel over a 2x2 polyphase-decomposed input.

    xph_ref: (4, 1, Hpo, Wpo, tci)  phases of padded x, channels on lanes
    w_ref:   (9, tci, Cout)         weight taps
    b_ref:   (1, Cout)              bias (f32)
    o_ref:   (1, Ho*Wo, Cout)       lane-dense output block
    acc_ref: (Ho*Wo, Cout) f32      only when the Cin contraction is tiled
    """
    KH = KW = 3

    def taps_matmul(xph_ref, w_ref):
        acc = None
        for kh in range(KH):
            for kw in range(KW):
                ph = (kh % 2) * 2 + (kw % 2)      # which polyphase holds this tap
                dh, dw = kh // 2, kw // 2         # unit offset inside that phase
                a = xph_ref[ph, 0, dh:dh + Ho, dw:dw + Wo, :].reshape(Ho * Wo, tci)
                d = jnp.dot(a, w_ref[kh * KW + kw],
                            preferred_element_type=jnp.float32)
                acc = d if acc is None else acc + d
        return acc

    if not multi_k:
        def kernel(xph_ref, w_ref, b_ref, o_ref):
            o_ref[0] = (taps_matmul(xph_ref, w_ref) + b_ref[...]).astype(o_ref.dtype)
        return kernel

    def kernel(xph_ref, w_ref, b_ref, o_ref, acc_ref):
        ci = pl.program_id(1)

        @pl.when(ci == 0)
        def _init():
            acc_ref[...] = jnp.zeros_like(acc_ref)

        acc_ref[...] += taps_matmul(xph_ref, w_ref)

        @pl.when(ci == pl.num_programs(1) - 1)
        def _finalize():
            o_ref[0] = (acc_ref[...] + b_ref[...]).astype(o_ref.dtype)

    return kernel


def downsample_forward(x, weight, bias, temb=None, *,
                       compute_dtype=jnp.bfloat16,
                       min_pallas_channels=64,
                       cin_block_limit=None):
    """DownSample forward: Conv2d(C, Cout, 3, stride=2, padding=1) + bias.

    x:      (N, C, H, W) float32 (NCHW, like PyTorch);  weight: (Cout, C, 3, 3);
    bias: (Cout,);  temb is ignored (the PyTorch module drops it).
    compute_dtype: matmul operand dtype (default bf16, f32 accumulation);
        None keeps x.dtype.  min_pallas_channels routes tiny-C layers to
        lax.conv.  cin_block_limit is a test knob forcing Cin tiling.
    """
    del temb  # DownSample.forward ignores temb
    N, C, H, W = x.shape
    Cout = weight.shape[0]
    KH = KW = 3
    Ho = (H + 2 - KH) // 2 + 1
    Wo = (W + 2 - KW) // 2 + 1

    # Small-channel layers: MXU row utilization is <=50% (v5e) / <=25% (v6e/v7x)
    # and glue dominates -> XLA's conv wins outright.
    if C < min_pallas_channels:
        return conv_ref(x, weight, bias)
    # Fused path assumes even spatial dims (uniform 2x2 polyphase shapes) and
    # Wo % 8 == 0 (layout-preserving (Ho, Wo, C) -> (Ho*Wo, C) reshape).
    if H % 2 or W % 2 or Wo % 8:
        return conv_ref(x, weight, bias)  # TODO(synk): halo-tiled path for odd/ragged spatial dims

    op_dtype = jnp.dtype(compute_dtype) if compute_dtype is not None else jnp.dtype(x.dtype)
    out_dtype = x.dtype
    isize = op_dtype.itemsize
    osize = jnp.dtype(out_dtype).itemsize
    Hpo, Wpo = Ho + 1, Wo + 1

    # ---- per-generation VMEM budgeting / Cin tiling ------------------------
    budget = int(_vmem_capacity_bytes() * 0.78)   # ~100 MiB v5e/v6e, ~50 MiB v7x

    def vmem_need(tci_, with_acc):
        x_blk = 4 * Hpo * Wpo * tci_ * isize
        w_blk = KH * KW * tci_ * Cout * isize
        b_blk = Cout * 4
        o_blk = Ho * Wo * Cout * osize
        acc = Ho * Wo * Cout * 4 if with_acc else 0
        return 2 * (x_blk + w_blk + b_blk) + 2 * o_blk + acc  # double-buffered I/O

    if vmem_need(C, False) <= budget:
        tci, n_ci = C, 1          # whole contraction resident, weight DMA'd once
    else:
        tci = None
        for mult in range(max(C // 128, 1), 0, -1):   # balanced 128-multiple blocks
            cand = 128 * mult
            if cand < C and vmem_need(cand, True) <= budget:
                tci = cand
                break
        if tci is None:
            # TODO(synk): spatially (halo-)tiled variant for very large H*W layers.
            return conv_ref(x, weight, bias)
        n_ci = -(-C // tci)

    if cin_block_limit is not None and C > max(int(cin_block_limit), 128):
        tci = max(128, (int(cin_block_limit) // 128) * 128)
        n_ci = -(-C // tci)
    C_pad = n_ci * tci

    # ---- operand prep: ONE cheap pass (cast early -> half-width HBM traffic).
    # 2x2 polyphase decomposition of the padded NHWC input: phase (a, b) holds
    # x_pad[:, a::2, b::2, :]; tap (kh, kw) of the stride-2 conv then reads
    # phase (kh%2, kw%2) at unit offset (kh//2, kw//2), so the kernel only ever
    # needs static unit-shifted slices (no strided loads, no im2col tensor).
    xc = x.astype(op_dtype)
    wc = weight.astype(op_dtype)
    x_nhwc = jnp.transpose(xc, (0, 2, 3, 1))                        # (N, H, W, C)
    xp = jnp.pad(x_nhwc, ((0, 0), (1, 1), (1, 1), (0, 0)))          # (N, H+2, W+2, C)
    x_ph = jnp.stack([xp[:, a::2, b::2, :] for a in (0, 1) for b in (0, 1)],
                     axis=0)                                        # (4, N, Hpo, Wpo, C)
    if C_pad != C:
        x_ph = jnp.pad(x_ph, ((0, 0),) * 4 + ((0, C_pad - C),))

    w_r = jnp.transpose(wc, (2, 3, 1, 0)).reshape(KH * KW, C, Cout)  # (9, C, Cout)
    if C_pad != C:
        w_r = jnp.pad(w_r, ((0, 0), (0, C_pad - C), (0, 0)))
    b_r = bias.astype(jnp.float32).reshape(1, Cout)

    kernel = _make_downsample_kernel(Ho, Wo, tci, n_ci > 1)
    scratch = [pltpu.VMEM((Ho * Wo, Cout), jnp.float32)] if n_ci > 1 else []

    w_bytes = KH * KW * C_pad * Cout * isize
    cost = pl.CostEstimate(
        flops=2 * N * Ho * Wo * KH * KW * C * Cout,
        transcendentals=0,
        bytes_accessed=(x_ph.size * isize                      # activations read once
                        + w_bytes * (N if n_ci > 1 else 1)     # weight re-fetch when K-tiled
                        + N * Ho * Wo * Cout * osize + Cout * 4))

    vmem_limit = int(min(budget, max(32 << 20, vmem_need(tci, n_ci > 1) + (8 << 20))))

    out_flat = pl.pallas_call(
        kernel,
        out_shape=jax.ShapeDtypeStruct((N, Ho * Wo, Cout), out_dtype),
        grid_spec=pltpu.PrefetchScalarGridSpec(
            num_scalar_prefetch=0,
            grid=(N, n_ci),                                     # reduction axis last
            in_specs=[
                pl.BlockSpec((4, 1, Hpo, Wpo, tci), lambda n, k: (0, n, 0, 0, k)),
                pl.BlockSpec((KH * KW, tci, Cout), lambda n, k: (0, k, 0)),
                pl.BlockSpec((1, Cout), lambda n, k: (0, 0)),
            ],
            out_specs=pl.BlockSpec((1, Ho * Wo, Cout), lambda n, k: (n, 0, 0)),
            scratch_shapes=scratch),
        compiler_params=pltpu.CompilerParams(
            dimension_semantics=("parallel", "arbitrary"),
            vmem_limit_bytes=vmem_limit),
        cost_estimate=cost,
    )(x_ph, w_r, b_r)

    # Back to NCHW to match the PyTorch module.  TODO(synk): keep NHWC across a
    # fused UNet so this (output-sized) transpose disappears.
    return out_flat.reshape(N, Ho, Wo, Cout).transpose(0, 3, 1, 2)


def init_downsample_params(key, in_ch):
    """Matches the module init: xavier_uniform weight, zero bias."""
    KH = KW = 3
    fan_in = in_ch * KH * KW
    fan_out = in_ch * KH * KW
    bound = math.sqrt(6.0 / (fan_in + fan_out))
    weight = jax.random.uniform(key, (in_ch, in_ch, KH, KW), dtype=jnp.float32,
                                minval=-bound, maxval=bound)
    bias = jnp.zeros((in_ch,), dtype=jnp.float32)
    return weight, bias


if __name__ == "__main__":
    key = jax.random.PRNGKey(0)
    k_x, k_w, k_x2, k_w2, k_b2 = jax.random.split(key, 5)

    # Small shapes consistent with the module (DownSample inside the UNet).
    N, C, H, W = 2, 4, 16, 16
    x = jax.random.normal(k_x, (N, C, H, W), dtype=jnp.float32)
    temb = jnp.zeros((N, 32), dtype=jnp.float32)   # ignored by DownSample
    weight, bias = init_downsample_params(k_w, C)
    ref = conv_ref(x, weight, bias)

    # f32-operand Pallas path (min_pallas_channels=0 forces the kernel even at
    # C=4; production dispatch would send such tiny layers to lax.conv).
    out = downsample_forward(x, weight, bias, temb,
                             compute_dtype=jnp.float32, min_pallas_channels=0)
    out = jax.block_until_ready(out)
    assert out.shape == (N, C, H // 2, W // 2), out.shape
    assert jnp.allclose(out, ref, atol=1e-4, rtol=1e-4), "f32 mismatch vs reference conv"

    # Default path: bf16 operands on the MXU, f32 accumulation.
    out_bf16 = jax.block_until_ready(
        downsample_forward(x, weight, bias, temb, min_pallas_channels=0))
    assert out_bf16.shape == (N, C, H // 2, W // 2)
    assert jnp.allclose(out_bf16, ref, atol=1e-1, rtol=1e-1), "bf16 mismatch vs reference conv"

    # Production-like channel count, forcing the Cin-tiled accumulator path.
    C2 = 256
    x2 = jax.random.normal(k_x2, (N, C2, H, W), dtype=jnp.float32)
    w2, _ = init_downsample_params(k_w2, C2)
    b2 = 0.1 * jax.random.normal(k_b2, (C2,), dtype=jnp.float32)
    out2 = jax.block_until_ready(
        downsample_forward(x2, w2, b2, temb, compute_dtype=jnp.float32,
                           min_pallas_channels=0, cin_block_limit=128))
    ref2 = conv_ref(x2, w2, b2)
    assert out2.shape == (N, C2, H // 2, W // 2)
    assert jnp.allclose(out2, ref2, atol=1e-3, rtol=1e-3), "Cin-tiled path mismatch"

    print("KERNEL_OK")
</pallas_src>

<mosaic_0001>
module attributes {stable_mosaic.version = 11 : i64} {
  func.func @kernel(%arg0: i32, %arg1: i32, %arg2: memref<4x1x9x9x4xf32, #tpu.memory_space<vmem>>, %arg3: memref<9x4x4xf32, #tpu.memory_space<vmem>>, %arg4: memref<1x4xf32, #tpu.memory_space<vmem>>, %arg5: memref<1x64x4xf32, #tpu.memory_space<vmem>>) attributes {dimension_semantics = [#tpu.dimension_semantics<parallel>, #tpu.dimension_semantics<arbitrary>], iteration_bounds = array<i64: 2, 1>, scalar_prefetch = 0 : i64, scratch_operands = 0 : i64, tpu.core_type = #tpu.core_type<tc>, window_params = [{transform_indices = @transform_0, window_bounds = array<i64: 4, 1, 9, 9, 4>}, {transform_indices = @transform_1, window_bounds = array<i64: 9, 4, 4>}, {pipeline_mode = #tpu.pipeline_mode<synchronous>, transform_indices = @transform_2, window_bounds = array<i64: 1, 4>}, {transform_indices = @transform_3, window_bounds = array<i64: 1, 64, 4>}]} {
    %c0 = arith.constant 0 : index
    %c0_0 = arith.constant 0 : index
    %c0_1 = arith.constant 0 : index
    %c0_2 = arith.constant 0 : index
    %c0_3 = arith.constant 0 : index
    %0 = vector.load %arg2[%c0, %c0_0, %c0_1, %c0_2, %c0_3] : memref<4x1x9x9x4xf32, #tpu.memory_space<vmem>>, vector<1x1x8x8x4xf32>
    %1 = vector.shape_cast %0 : vector<1x1x8x8x4xf32> to vector<8x8x4xf32>
    %2 = vector.shape_cast %1 : vector<8x8x4xf32> to vector<64x4xf32>
    %c0_4 = arith.constant 0 : index
    %c0_5 = arith.constant 0 : index
    %c0_6 = arith.constant 0 : index
    %3 = vector.load %arg3[%c0_4, %c0_5, %c0_6] : memref<9x4x4xf32, #tpu.memory_space<vmem>>, vector<1x4x4xf32>
    %4 = vector.shape_cast %3 : vector<1x4x4xf32> to vector<4x4xf32>
    %cst = arith.constant dense<0.000000e+00> : vector<64x4xf32>
    %5 = tpu.matmul %2, %4, %cst {dimension_numbers = #tpu.dot_dimension_numbers<[1], [0], [0], [1], [0, 0, 1, 1], [], []>} : vector<64x4xf32>, vector<4x4xf32>, vector<64x4xf32> -> vector<64x4xf32>
    %c1 = arith.constant 1 : index
    %c0_7 = arith.constant 0 : index
    %c0_8 = arith.constant 0 : index
    %c0_9 = arith.constant 0 : index
    %c0_10 = arith.constant 0 : index
    %6 = vector.load %arg2[%c1, %c0_7, %c0_8, %c0_9, %c0_10] : memref<4x1x9x9x4xf32, #tpu.memory_space<vmem>>, vector<1x1x8x8x4xf32>
    %7 = vector.shape_cast %6 : vector<1x1x8x8x4xf32> to vector<8x8x4xf32>
    %8 = vector.shape_cast %7 : vector<8x8x4xf32> to vector<64x4xf32>
    %c1_11 = arith.constant 1 : index
    %c0_12 = arith.constant 0 : index
    %c0_13 = arith.constant 0 : index
    %9 = vector.load %arg3[%c1_11, %c0_12, %c0_13] : memref<9x4x4xf32, #tpu.memory_space<vmem>>, vector<1x4x4xf32>
    %10 = vector.shape_cast %9 : vector<1x4x4xf32> to vector<4x4xf32>
    %cst_14 = arith.constant dense<0.000000e+00> : vector<64x4xf32>
    %11 = tpu.matmul %8, %10, %cst_14 {dimension_numbers = #tpu.dot_dimension_numbers<[1], [0], [0], [1], [0, 0, 1, 1], [], []>} : vector<64x4xf32>, vector<4x4xf32>, vector<64x4xf32> -> vector<64x4xf32>
    %12 = arith.addf %5, %11 : vector<64x4xf32>
    %c0_15 = arith.constant 0 : index
    %c0_16 = arith.constant 0 : index
    %c0_17 = arith.constant 0 : index
    %c1_18 = arith.constant 1 : index
    %c0_19 = arith.constant 0 : index
    %13 = vector.load %arg2[%c0_15, %c0_16, %c0_17, %c1_18, %c0_19] : memref<4x1x9x9x4xf32, #tpu.memory_space<vmem>>, vector<1x1x8x8x4xf32>
    %14 = vector.shape_cast %13 : vector<1x1x8x8x4xf32> to vector<8x8x4xf32>
    %15 = vector.shape_cast %14 : vector<8x8x4xf32> to vector<64x4xf32>
    %c2 = arith.constant 2 : index
    %c0_20 = arith.constant 0 : index
    %c0_21 = arith.constant 0 : index
    %16 = vector.load %arg3[%c2, %c0_20, %c0_21] : memref<9x4x4xf32, #tpu.memory_space<vmem>>, vector<1x4x4xf32>
    %17 = vector.shape_cast %16 : vector<1x4x4xf32> to vector<4x4xf32>
    %cst_22 = arith.constant dense<0.000000e+00> : vector<64x4xf32>
    %18 = tpu.matmul %15, %17, %cst_22 {dimension_numbers = #tpu.dot_dimension_numbers<[1], [0], [0], [1], [0, 0, 1, 1], [], []>} : vector<64x4xf32>, vector<4x4xf32>, vector<64x4xf32> -> vector<64x4xf32>
    %19 = arith.addf %12, %18 : vector<64x4xf32>
    %c2_23 = arith.constant 2 : index
    %c0_24 = arith.constant 0 : index
    %c0_25 = arith.constant 0 : index
    %c0_26 = arith.constant 0 : index
    %c0_27 = arith.constant 0 : index
    %20 = vector.load %arg2[%c2_23, %c0_24, %c0_25, %c0_26, %c0_27] : memref<4x1x9x9x4xf32, #tpu.memory_space<vmem>>, vector<1x1x8x8x4xf32>
    %21 = vector.shape_cast %20 : vector<1x1x8x8x4xf32> to vector<8x8x4xf32>
    %22 = vector.shape_cast %21 : vector<8x8x4xf32> to vector<64x4xf32>
    %c3 = arith.constant 3 : index
    %c0_28 = arith.constant 0 : index
    %c0_29 = arith.constant 0 : index
    %23 = vector.load %arg3[%c3, %c0_28, %c0_29] : memref<9x4x4xf32, #tpu.memory_space<vmem>>, vector<1x4x4xf32>
    %24 = vector.shape_cast %23 : vector<1x4x4xf32> to vector<4x4xf32>
    %cst_30 = arith.constant dense<0.000000e+00> : vector<64x4xf32>
    %25 = tpu.matmul %22, %24, %cst_30 {dimension_numbers = #tpu.dot_dimension_numbers<[1], [0], [0], [1], [0, 0, 1, 1], [], []>} : vector<64x4xf32>, vector<4x4xf32>, vector<64x4xf32> -> vector<64x4xf32>
    %26 = arith.addf %19, %25 : vector<64x4xf32>
    %c3_31 = arith.constant 3 : index
    %c0_32 = arith.constant 0 : index
    %c0_33 = arith.constant 0 : index
    %c0_34 = arith.constant 0 : index
    %c0_35 = arith.constant 0 : index
    %27 = vector.load %arg2[%c3_31, %c0_32, %c0_33, %c0_34, %c0_35] : memref<4x1x9x9x4xf32, #tpu.memory_space<vmem>>, vector<1x1x8x8x4xf32>
    %28 = vector.shape_cast %27 : vector<1x1x8x8x4xf32> to vector<8x8x4xf32>
    %29 = vector.shape_cast %28 : vector<8x8x4xf32> to vector<64x4xf32>
    %c4 = arith.constant 4 : index
    %c0_36 = arith.constant 0 : index
    %c0_37 = arith.constant 0 : index
    %30 = vector.load %arg3[%c4, %c0_36, %c0_37] : memref<9x4x4xf32, #tpu.memory_space<vmem>>, vector<1x4x4xf32>
    %31 = vector.shape_cast %30 : vector<1x4x4xf32> to vector<4x4xf32>
    %cst_38 = arith.constant dense<0.000000e+00> : vector<64x4xf32>
    %32 = tpu.matmul %29, %31, %cst_38 {dimension_numbers = #tpu.dot_dimension_numbers<[1], [0], [0], [1], [0, 0, 1, 1], [], []>} : vector<64x4xf32>, vector<4x4xf32>, vector<64x4xf32> -> vector<64x4xf32>
    %33 = arith.addf %26, %32 : vector<64x4xf32>
    %c2_39 = arith.constant 2 : index
    %c0_40 = arith.constant 0 : index
    %c0_41 = arith.constant 0 : index
    %c1_42 = arith.constant 1 : index
    %c0_43 = arith.constant 0 : index
    %34 = vector.load %arg2[%c2_39, %c0_40, %c0_41, %c1_42, %c0_43] : memref<4x1x9x9x4xf32, #tpu.memory_space<vmem>>, vector<1x1x8x8x4xf32>
    %35 = vector.shape_cast %34 : vector<1x1x8x8x4xf32> to vector<8x8x4xf32>
    %36 = vector.shape_cast %35 : vector<8x8x4xf32> to vector<64x4xf32>
    %c5 = arith.constant 5 : index
    %c0_44 = arith.constant 0 : index
    %c0_45 = arith.constant 0 : index
    %37 = vector.load %arg3[%c5, %c0_44, %c0_45] : memref<9x4x4xf32, #tpu.memory_space<vmem>>, vector<1x4x4xf32>
    %38 = vector.shape_cast %37 : vector<1x4x4xf32> to vector<4x4xf32>
    %cst_46 = arith.constant dense<0.000000e+00> : vector<64x4xf32>
    %39 = tpu.matmul %36, %38, %cst_46 {dimension_numbers = #tpu.dot_dimension_numbers<[1], [0], [0], [1], [0, 0, 1, 1], [], []>} : vector<64x4xf32>, vector<4x4xf32>, vector<64x4xf32> -> vector<64x4xf32>
    %40 = arith.addf %33, %39 : vector<64x4xf32>
    %c0_47 = arith.constant 0 : index
    %c0_48 = arith.constant 0 : index
    %c1_49 = arith.constant 1 : index
    %c0_50 = arith.constant 0 : index
    %c0_51 = arith.constant 0 : index
    %41 = vector.load %arg2[%c0_47, %c0_48, %c1_49, %c0_50, %c0_51] : memref<4x1x9x9x4xf32, #tpu.memory_space<vmem>>, vector<1x1x8x8x4xf32>
    %42 = vector.shape_cast %41 : vector<1x1x8x8x4xf32> to vector<8x8x4xf32>
    %43 = vector.shape_cast %42 : vector<8x8x4xf32> to vector<64x4xf32>
    %c6 = arith.constant 6 : index
    %c0_52 = arith.constant 0 : index
    %c0_53 = arith.constant 0 : index
    %44 = vector.load %arg3[%c6, %c0_52, %c0_53] : memref<9x4x4xf32, #tpu.memory_space<vmem>>, vector<1x4x4xf32>
    %45 = vector.shape_cast %44 : vector<1x4x4xf32> to vector<4x4xf32>
    %cst_54 = arith.constant dense<0.000000e+00> : vector<64x4xf32>
    %46 = tpu.matmul %43, %45, %cst_54 {dimension_numbers = #tpu.dot_dimension_numbers<[1], [0], [0], [1], [0, 0, 1, 1], [], []>} : vector<64x4xf32>, vector<4x4xf32>, vector<64x4xf32> -> vector<64x4xf32>
    %47 = arith.addf %40, %46 : vector<64x4xf32>
    %c1_55 = arith.constant 1 : index
    %c0_56 = arith.constant 0 : index
    %c1_57 = arith.constant 1 : index
    %c0_58 = arith.constant 0 : index
    %c0_59 = arith.constant 0 : index
    %48 = vector.load %arg2[%c1_55, %c0_56, %c1_57, %c0_58, %c0_59] : memref<4x1x9x9x4xf32, #tpu.memory_space<vmem>>, vector<1x1x8x8x4xf32>
    %49 = vector.shape_cast %48 : vector<1x1x8x8x4xf32> to vector<8x8x4xf32>
    %50 = vector.shape_cast %49 : vector<8x8x4xf32> to vector<64x4xf32>
    %c7 = arith.constant 7 : index
    %c0_60 = arith.constant 0 : index
    %c0_61 = arith.constant 0 : index
    %51 = vector.load %arg3[%c7, %c0_60, %c0_61] : memref<9x4x4xf32, #tpu.memory_space<vmem>>, vector<1x4x4xf32>
    %52 = vector.shape_cast %51 : vector<1x4x4xf32> to vector<4x4xf32>
    %cst_62 = arith.constant dense<0.000000e+00> : vector<64x4xf32>
    %53 = tpu.matmul %50, %52, %cst_62 {dimension_numbers = #tpu.dot_dimension_numbers<[1], [0], [0], [1], [0, 0, 1, 1], [], []>} : vector<64x4xf32>, vector<4x4xf32>, vector<64x4xf32> -> vector<64x4xf32>
    %54 = arith.addf %47, %53 : vector<64x4xf32>
    %c0_63 = arith.constant 0 : index
    %c0_64 = arith.constant 0 : index
    %c1_65 = arith.constant 1 : index
    %c1_66 = arith.constant 1 : index
    %c0_67 = arith.constant 0 : index
    %55 = vector.load %arg2[%c0_63, %c0_64, %c1_65, %c1_66, %c0_67] : memref<4x1x9x9x4xf32, #tpu.memory_space<vmem>>, vector<1x1x8x8x4xf32>
    %56 = vector.shape_cast %55 : vector<1x1x8x8x4xf32> to vector<8x8x4xf32>
    %57 = vector.shape_cast %56 : vector<8x8x4xf32> to vector<64x4xf32>
    %c8 = arith.constant 8 : index
    %c0_68 = arith.constant 0 : index
    %c0_69 = arith.constant 0 : index
    %58 = vector.load %arg3[%c8, %c0_68, %c0_69] : memref<9x4x4xf32, #tpu.memory_space<vmem>>, vector<1x4x4xf32>
    %59 = vector.shape_cast %58 : vector<1x4x4xf32> to vector<4x4xf32>
    %cst_70 = arith.constant dense<0.000000e+00> : vector<64x4xf32>
    %60 = tpu.matmul %57, %59, %cst_70 {dimension_numbers = #tpu.dot_dimension_numbers<[1], [0], [0], [1], [0, 0, 1, 1], [], []>} : vector<64x4xf32>, vector<4x4xf32>, vector<64x4xf32> -> vector<64x4xf32>
    %61 = arith.addf %54, %60 : vector<64x4xf32>
    %c0_71 = arith.constant 0 : index
    %c0_72 = arith.constant 0 : index
    %62 = vector.load %arg4[%c0_71, %c0_72] : memref<1x4xf32, #tpu.memory_space<vmem>>, vector<1x4xf32>
    %63 = vector.broadcast %62 : vector<1x4xf32> to vector<64x4xf32>
    %64 = arith.addf %61, %63 : vector<64x4xf32>
    %c0_73 = arith.constant 0 : index
    %c0_74 = arith.constant 0 : index
    %c0_75 = arith.constant 0 : index
    %65 = vector.load %arg5[%c0_73, %c0_74, %c0_75] : memref<1x64x4xf32, #tpu.memory_space<vmem>>, vector<1x64x4xf32>
    %66 = vector.shape_cast %65 : vector<1x64x4xf32> to vector<64x4xf32>
    %67 = vector.shape_cast %64 : vector<64x4xf32> to vector<1x64x4xf32>
    tpu.vector_store %arg5[%c0_73, %c0_74, %c0_75], %67 {strides = array<i32>} : memref<1x64x4xf32, #tpu.memory_space<vmem>>, vector<1x64x4xf32>,
    return
  }
  func.func @transform_0(%arg0: i32, %arg1: i32) -> (i32, i32, i32, i32, i32) {
    %c0_i32 = arith.constant 0 : i32
    %c0_i32_0 = arith.constant 0 : i32
    %c0_i32_1 = arith.constant 0 : i32
    %c0_i32_2 = arith.constant 0 : i32
    return %c0_i32, %arg0, %c0_i32_0, %c0_i32_1, %arg1 : i32, i32, i32, i32, i32
  }
  func.func @transform_1(%arg0: i32, %arg1: i32) -> (i32, i32, i32) {
    %c0_i32 = arith.constant 0 : i32
    %c0_i32_0 = arith.constant 0 : i32
    %c0_i32_1 = arith.constant 0 : i32
    return %c0_i32, %arg1, %c0_i32_0 : i32, i32, i32
  }
  func.func @transform_2(%arg0: i32, %arg1: i32) -> (i32, i32) {
    %c0_i32 = arith.constant 0 : i32
    %c0_i32_0 = arith.constant 0 : i32
    %c0_i32_1 = arith.constant 0 : i32
    return %c0_i32, %c0_i32_0 : i32, i32
  }
  func.func @transform_3(%arg0: i32, %arg1: i32) -> (i32, i32, i32) {
    %c0_i32 = arith.constant 0 : i32
    %c0_i32_0 = arith.constant 0 : i32
    %c0_i32_1 = arith.constant 0 : i32
    return %arg0, %c0_i32, %c0_i32_0 : i32, i32, i32
  }
}

</mosaic_0001>

<bundles_post_ra>
// kernel: tpu_custom_call.1
= control target key start
LH: loop header
LB: loop body
LE: loop exit
PB: predicated region body
PF: predicated region fallthrough
CT: control target
= control target key end

     0   :  { %s1658_s12 = smov 0   ;;  %s1660_s13 = smov 0   ;;  %s2164_s0 = inlined_call_operand.vmem [shape: f32[4,2,9,9,4], index: 0, kind: input, shape index: {}]   ;;  %s2165_s1 = inlined_call_operand.vmem [shape: f32[9,4,4], index: 1, kind: input, shape index: {}]   ;;  %s2166_s2 = inlined_call_operand.vmem [shape: f32[1,4], index: 2, kind: input, shape index: {}]   ;;  %s2167_s3 = inlined_call_operand.vmem [shape: f32[2,64,4], index: 3, kind: output, shape index: {}]  }
   0x1   :  { %s1662_s14 = smov 0   ;;  %s1664_s15 = smov 0  }
   0x2   :  { %s1666_s16 = smov 0  }
   0x3 LB: > { %s25_s17 = sadd.s32 1, %s1632_s15  ;;  %p41_p1 = scmp.ne.s32.totalorder %s1624_s13, %s1620_s12  ;;  %s1636_s16 = sphi %s1666_s16, %s13_s16   ;;  %s1632_s15 = sphi %s1664_s15, %s2171_s15   ;;  %s1628_s14 = sphi %s1662_s14, %s2170_s14   ;;  %s1624_s13 = sphi %s1660_s13, %s2169_s13   ;;  %s1620_s12 = sphi %s1658_s12, %s2168_s12  }
   0x4   : > { %p27_p0 = scmp.ge.s32.totalorder %s25_s17, 2  ;;  %p42_p2 = scmp.eq.s32.totalorder %s1636_s16, 0 }
   0x5   : > { %s34_s19 = sadd.s32 1, %s1624_s13  ;;  %p1398_p5 = scmp.ge.s32.totalorder %s1636_s16, 2 }
   0x6   : > { %s2173_s17 = smov (%p27_p0, %s25_s17), 0  ;;  %p43_p3 = por %p42_p2, %p41_p1 }
   0x7   : > { %s29_s18 = ssub.s32 %s1632_s15, %s2173_s17  ;;  %150 = sbr.rel (%p1398_p5) target bundleno = 89 (0x59), region = 24 }
   0x8   : > { %p32_p4 = scmp.eq.s32.totalorder %s29_s18, 0 }
   0xa   : > { %s1693_s20 = scalar_select %p32_p4, %s1624_s13, %s34_s19  }
   0xc   : > { %153 = sbr.rel (!%p43_p3) target bundleno = 89 (0x59), region = 28  ;;  %s155_s21 = sand.u32 (%p43_p3), 1, %s1624_s13  }
   0xd   : > { %s1555_s22 = smul.u32 (%p43_p3), 144, %s1632_s15 }
   0xe   : > { %s1554_s23 = smul.u32 (%p43_p3), 576, %s155_s21 }
   0xf   : > { %s1701_s26 = scalar_lea.vmem (%p43_p3), %s2164_s0, %s1555_s22 }
  0x10   : > { %v332_v0 = vld [vmem:[%s1701_s26] sm:$0xff] (%p43_p3)  ;;  %v334_v1 = vld [vmem:[%s1701_s26 + $0x8] sm:$0xff] (%p43_p3)  ;;  %v336_v2 = vld [vmem:[%s1701_s26 + $0x10] sm:$0xff] (%p43_p3)  ;;  %s1706_s27 = scalar_lea.vmem (%p43_p3), [#allocation2], %s1554_s23 }
  0x11   : > { %333 = vst [vmem:[%s1706_s27] sm:$0xff] %v332_v0  ;;  %v338_v3 = vld [vmem:[%s1701_s26 + $0x18] sm:$0xff]  ;;  %v340_v4 = vld [vmem:[%s1701_s26 + $0x20] sm:$0xff]  ;;  %v342_v5 = vld [vmem:[%s1701_s26 + $0x28] sm:$0xff] }
  0x12   : > { %335 = vst [vmem:[%s1706_s27 + $0x8] sm:$0xff] %v334_v1  ;;  %v344_v6 = vld [vmem:[%s1701_s26 + $0x30] sm:$0xff]  ;;  %v346_v7 = vld [vmem:[%s1701_s26 + $0x38] sm:$0xff]  ;;  %v348_v8 = vld [vmem:[%s1701_s26 + $0x40] sm:$0xff] }
  0x13   : > { %337 = vst [vmem:[%s1706_s27 + $0x10] sm:$0xff] %v336_v2  ;;  %v350_v9 = vld [vmem:[%s1701_s26 + $0x48] sm:$0xff]  ;;  %v352_v10 = vld [vmem:[%s1701_s26 + $0x50] sm:$0xff]  ;;  %v354_v11 = vld [vmem:[%s1701_s26 + $0x58] sm:$0xff] }
  0x14   : > { %339 = vst [vmem:[%s1706_s27 + $0x18] sm:$0xff] %v338_v3  ;;  %v356_v12 = vld [vmem:[%s1701_s26 + $0x60] sm:$0xff]  ;;  %v358_v13 = vld [vmem:[%s1701_s26 + $0x68] sm:$0xff]  ;;  %v360_v14 = vld [vmem:[%s1701_s26 + $0x70] sm:$0xff] }
  0x15   : > { %341 = vst [vmem:[%s1706_s27 + $0x20] sm:$0xff] %v340_v4  ;;  %v362_v15 = vld [vmem:[%s1701_s26 + $0x78] sm:$0xff]  ;;  %v364_v16 = vld [vmem:[%s1701_s26 + $0x80] sm:$0xff]  ;;  %v366_v17 = vld [vmem:[%s1701_s26 + $0x88] sm:$0xff] }
  0x16   : > { %343 = vst [vmem:[%s1706_s27 + $0x28] sm:$0xff] %v342_v5  ;;  %v368_v18 = vld [vmem:[%s1701_s26 + $0x120] sm:$0xff]  ;;  %v370_v19 = vld [vmem:[%s1701_s26 + $0x128] sm:$0xff]  ;;  %v372_v20 = vld [vmem:[%s1701_s26 + $0x130] sm:$0xff] }
  0x17   : > { %345 = vst [vmem:[%s1706_s27 + $0x30] sm:$0xff] %v344_v6  ;;  %v374_v21 = vld [vmem:[%s1701_s26 + $0x138] sm:$0xff]  ;;  %v376_v22 = vld [vmem:[%s1701_s26 + $0x140] sm:$0xff]  ;;  %v378_v23 = vld [vmem:[%s1701_s26 + $0x148] sm:$0xff] }
  0x18   : > { %347 = vst [vmem:[%s1706_s27 + $0x38] sm:$0xff] %v346_v7  ;;  %v380_v24 = vld [vmem:[%s1701_s26 + $0x150] sm:$0xff]  ;;  %v382_v25 = vld [vmem:[%s1701_s26 + $0x158] sm:$0xff]  ;;  %v384_v26 = vld [vmem:[%s1701_s26 + $0x160] sm:$0xff] }
  0x19   : > { %349 = vst [vmem:[%s1706_s27 + $0x40] sm:$0xff] %v348_v8  ;;  %v386_v27 = vld [vmem:[%s1701_s26 + $0x168] sm:$0xff]  ;;  %v388_v28 = vld [vmem:[%s1701_s26 + $0x170] sm:$0xff]  ;;  %v390_v29 = vld [vmem:[%s1701_s26 + $0x178] sm:$0xff] }
  0x1a   : > { %351 = vst [vmem:[%s1706_s27 + $0x48] sm:$0xff] %v350_v9  ;;  %v392_v30 = vld [vmem:[%s1701_s26 + $0x180] sm:$0xff]  ;;  %v394_v31 = vld [vmem:[%s1701_s26 + $0x188] sm:$0xff]  ;;  %v396_v32 = vld [vmem:[%s1701_s26 + $0x190] sm:$0xff] }
  0x1b   : > { %353 = vst [vmem:[%s1706_s27 + $0x50] sm:$0xff] %v352_v10  ;;  %v398_v33 = vld [vmem:[%s1701_s26 + $0x198] sm:$0xff]  ;;  %v400_v34 = vld [vmem:[%s1701_s26 + $0x1a0] sm:$0xff]  ;;  %v402_v35 = vld [vmem:[%s1701_s26 + $0x1a8] sm:$0xff] }
  0x1c   : > { %355 = vst [vmem:[%s1706_s27 + $0x58] sm:$0xff] %v354_v11  ;;  %v404_v36 = vld [vmem:[%s1701_s26 + $0x240] sm:$0xff]  ;;  %v406_v37 = vld [vmem:[%s1701_s26 + $0x248] sm:$0xff]  ;;  %v408_v38 = vld [vmem:[%s1701_s26 + $0x250] sm:$0xff] }
  0x1d   : > { %357 = vst [vmem:[%s1706_s27 + $0x60] sm:$0xff] %v356_v12  ;;  %v410_v39 = vld [vmem:[%s1701_s26 + $0x258] sm:$0xff]  ;;  %v412_v40 = vld [vmem:[%s1701_s26 + $0x260] sm:$0xff]  ;;  %v414_v41 = vld [vmem:[%s1701_s26 + $0x268] sm:$0xff] }
  0x1e   : > { %359 = vst [vmem:[%s1706_s27 + $0x68] sm:$0xff] %v358_v13  ;;  %v416_v42 = vld [vmem:[%s1701_s26 + $0x270] sm:$0xff]  ;;  %v418_v43 = vld [vmem:[%s1701_s26 + $0x278] sm:$0xff]  ;;  %v420_v44 = vld [vmem:[%s1701_s26 + $0x280] sm:$0xff] }
  0x1f   : > { %361 = vst [vmem:[%s1706_s27 + $0x70] sm:$0xff] %v360_v14  ;;  %v422_v45 = vld [vmem:[%s1701_s26 + $0x288] sm:$0xff]  ;;  %v424_v46 = vld [vmem:[%s1701_s26 + $0x290] sm:$0xff]  ;;  %v426_v47 = vld [vmem:[%s1701_s26 + $0x298] sm:$0xff] }
  0x20   : > { %363 = vst [vmem:[%s1706_s27 + $0x78] sm:$0xff] %v362_v15  ;;  %v428_v48 = vld [vmem:[%s1701_s26 + $0x2a0] sm:$0xff]  ;;  %v430_v49 = vld [vmem:[%s1701_s26 + $0x2a8] sm:$0xff]  ;;  %v432_v50 = vld [vmem:[%s1701_s26 + $0x2b0] sm:$0xff] }
  0x21   : > { %365 = vst [vmem:[%s1706_s27 + $0x80] sm:$0xff] %v364_v16  ;;  %v434_v51 = vld [vmem:[%s1701_s26 + $0x2b8] sm:$0xff]  ;;  %v436_v52 = vld [vmem:[%s1701_s26 + $0x2c0] sm:$0xff]  ;;  %v438_v53 = vld [vmem:[%s1701_s26 + $0x2c8] sm:$0xff] }
  0x22   : > { %367 = vst [vmem:[%s1706_s27 + $0x88] sm:$0xff] %v366_v17  ;;  %v440_v54 = vld [vmem:[%s1701_s26 + $0x360] sm:$0xff]  ;;  %v442_v55 = vld [vmem:[%s1701_s26 + $0x368] sm:$0xff]  ;;  %v444_v56 = vld [vmem:[%s1701_s26 + $0x370] sm:$0xff] }
  0x23   : > { %369 = vst [vmem:[%s1706_s27 + $0x90] sm:$0xff] %v368_v18  ;;  %v446_v57 = vld [vmem:[%s1701_s26 + $0x378] sm:$0xff]  ;;  %v448_v58 = vld [vmem:[%s1701_s26 + $0x380] sm:$0xff]  ;;  %v450_v59 = vld [vmem:[%s1701_s26 + $0x388] sm:$0xff] }
  0x24   : > { %371 = vst [vmem:[%s1706_s27 + $0x98] sm:$0xff] %v370_v19  ;;  %v452_v60 = vld [vmem:[%s1701_s26 + $0x390] sm:$0xff]  ;;  %v454_v61 = vld [vmem:[%s1701_s26 + $0x398] sm:$0xff]  ;;  %v456_v62 = vld [vmem:[%s1701_s26 + $0x3a0] sm:$0xff] }
  0x25   : > { %373 = vst [vmem:[%s1706_s27 + $0xa0] sm:$0xff] %v372_v20  ;;  %v458_v63 = vld [vmem:[%s1701_s26 + $0x3a8] sm:$0xff]  ;;  %v460_v0 = vld [vmem:[%s1701_s26 + $0x3b0] sm:$0xff]  ;;  %v462_v1 = vld [vmem:[%s1701_s26 + $0x3b8] sm:$0xff] }
  0x26   : > { %375 = vst [vmem:[%s1706_s27 + $0xa8] sm:$0xff] %v374_v21  ;;  %v464_v2 = vld [vmem:[%s1701_s26 + $0x3c0] sm:$0xff]  ;;  %v466_v3 = vld [vmem:[%s1701_s26 + $0x3c8] sm:$0xff]  ;;  %v468_v4 = vld [vmem:[%s1701_s26 + $0x3d0] sm:$0xff] }
  0x27   : > { %377 = vst [vmem:[%s1706_s27 + $0xb0] sm:$0xff] %v376_v22  ;;  %v470_v5 = vld [vmem:[%s1701_s26 + $0x3d8] sm:$0xff]  ;;  %v472_v6 = vld [vmem:[%s1701_s26 + $0x3e0] sm:$0xff]  ;;  %v474_v7 = vld [vmem:[%s1701_s26 + $0x3e8] sm:$0xff] }
  0x28   : > { %379 = vst [vmem:[%s1706_s27 + $0xb8] sm:$0xff] %v378_v23 }
  0x29   : > { %381 = vst [vmem:[%s1706_s27 + $0xc0] sm:$0xff] %v380_v24 }
  0x2a   : > { %383 = vst [vmem:[%s1706_s27 + $0xc8] sm:$0xff] %v382_v25 }
  0x2b   : > { %385 = vst [vmem:[%s1706_s27 + $0xd0] sm:$0xff] %v384_v26 }
  0x2c   : > { %387 = vst [vmem:[%s1706_s27 + $0xd8] sm:$0xff] %v386_v27 }
  0x2d   : > { %389 = vst [vmem:[%s1706_s27 + $0xe0] sm:$0xff] %v388_v28 }
  0x2e   : > { %391 = vst [vmem:[%s1706_s27 + $0xe8] sm:$0xff] %v390_v29 }
  0x2f   : > { %393 = vst [vmem:[%s1706_s27 + $0xf0] sm:$0xff] %v392_v30 }
  0x30   : > { %395 = vst [vmem:[%s1706_s27 + $0xf8] sm:$0xff] %v394_v31 }
  0x31   : > { %397 = vst [vmem:[%s1706_s27 + $0x100] sm:$0xff] %v396_v32 }
  0x32   : > { %399 = vst [vmem:[%s1706_s27 + $0x108] sm:$0xff] %v398_v33 }
  0x33   : > { %401 = vst [vmem:[%s1706_s27 + $0x110] sm:$0xff] %v400_v34 }
  0x34   : > { %403 = vst [vmem:[%s1706_s27 + $0x118] sm:$0xff] %v402_v35 }
  0x35   : > { %405 = vst [vmem:[%s1706_s27 + $0x120] sm:$0xff] %v404_v36 }
  0x36   : > { %407 = vst [vmem:[%s1706_s27 + $0x128] sm:$0xff] %v406_v37 }
  0x37   : > { %409 = vst [vmem:[%s1706_s27 + $0x130] sm:$0xff] %v408_v38 }
  0x38   : > { %411 = vst [vmem:[%s1706_s27 + $0x138] sm:$0xff] %v410_v39 }
  0x39   : > { %413 = vst [vmem:[%s1706_s27 + $0x140] sm:$0xff] %v412_v40 }
  0x3a   : > { %415 = vst [vmem:[%s1706_s27 + $0x148] sm:$0xff] %v414_v41 }
  0x3b   : > { %417 = vst [vmem:[%s1706_s27 + $0x150] sm:$0xff] %v416_v42 }
  0x3c   : > { %419 = vst [vmem:[%s1706_s27 + $0x158] sm:$0xff] %v418_v43 }
  0x3d   : > { %421 = vst [vmem:[%s1706_s27 + $0x160] sm:$0xff] %v420_v44 }
  0x3e   : > { %423 = vst [vmem:[%s1706_s27 + $0x168] sm:$0xff] %v422_v45 }
  0x3f   : > { %425 = vst [vmem:[%s1706_s27 + $0x170] sm:$0xff] %v424_v46 }
  0x40   : > { %427 = vst [vmem:[%s1706_s27 + $0x178] sm:$0xff] %v426_v47 }
  0x41   : > { %429 = vst [vmem:[%s1706_s27 + $0x180] sm:$0xff] %v428_v48 }
  0x42   : > { %431 = vst [vmem:[%s1706_s27 + $0x188] sm:$0xff] %v430_v49 }
  0x43   : > { %433 = vst [vmem:[%s1706_s27 + $0x190] sm:$0xff] %v432_v50 }
  0x44   : > { %435 = vst [vmem:[%s1706_s27 + $0x198] sm:$0xff] %v434_v51 }
  0x45   : > { %437 = vst [vmem:[%s1706_s27 + $0x1a0] sm:$0xff] %v436_v52 }
  0x46   : > { %439 = vst [vmem:[%s1706_s27 + $0x1a8] sm:$0xff] %v438_v53 }
  0x47   : > { %441 = vst [vmem:[%s1706_s27 + $0x1b0] sm:$0xff] %v440_v54 }
  0x48   : > { %443 = vst [vmem:[%s1706_s27 + $0x1b8] sm:$0xff] %v442_v55 }
  0x49   : > { %445 = vst [vmem:[%s1706_s27 + $0x1c0] sm:$0xff] %v444_v56 }
  0x4a   : > { %447 = vst [vmem:[%s1706_s27 + $0x1c8] sm:$0xff] %v446_v57 }
  0x4b   : > { %449 = vst [vmem:[%s1706_s27 + $0x1d0] sm:$0xff] %v448_v58 }
  0x4c   : > { %451 = vst [vmem:[%s1706_s27 + $0x1d8] sm:$0xff] %v450_v59 }
  0x4d   : > { %453 = vst [vmem:[%s1706_s27 + $0x1e0] sm:$0xff] %v452_v60 }
  0x4e   : > { %455 = vst [vmem:[%s1706_s27 + $0x1e8] sm:$0xff] %v454_v61 }
  0x4f   : > { %457 = vst [vmem:[%s1706_s27 + $0x1f0] sm:$0xff] %v456_v62 }
  0x50   : > { %459 = vst [vmem:[%s1706_s27 + $0x1f8] sm:$0xff] %v458_v63 }
  0x51   : > { %461 = vst [vmem:[%s1706_s27 + $0x200] sm:$0xff] %v460_v0 }
  0x52   : > { %463 = vst [vmem:[%s1706_s27 + $0x208] sm:$0xff] %v462_v1 }
  0x53   : > { %465 = vst [vmem:[%s1706_s27 + $0x210] sm:$0xff] %v464_v2 }
  0x54   : > { %467 = vst [vmem:[%s1706_s27 + $0x218] sm:$0xff] %v466_v3 }
  0x55   : > { %469 = vst [vmem:[%s1706_s27 + $0x220] sm:$0xff] %v468_v4 }
  0x56   : > { %471 = vst [vmem:[%s1706_s27 + $0x228] sm:$0xff] %v470_v5 }
  0x57   : > { %473 = vst [vmem:[%s1706_s27 + $0x230] sm:$0xff] %v472_v6 }
  0x58   : > { %475 = vst [vmem:[%s1706_s27 + $0x238] sm:$0xff] %v474_v7 }
  0x59 PF: > { %p1400_p6 = scmp.ge.s32.totalorder %s1636_s16, 1  ;;  %p480_p7 = scmp.lt.s32.totalorder %s1636_s16, 3 }
  0x5b   : > { %p481_p8 = pnand %p1400_p6, %p480_p7 }
  0x5c   : > { %s487_s30 = sand.u32 (!%p481_p8), 1, %s1620_s12   ;;  %p518_p9 = scmp.lt.s32.totalorder (!%p481_p8), %s1628_s14, 1 }
  0x5d   : > { %484 = sbr.rel (%p481_p8) target bundleno = 380 (0x17c), region = 66 }
  0x5e   : > { %s1556_s4 = smul.u32 (!%p481_p8), 576, %s487_s30 }
  0x60   : > { %s1876_s21 = scalar_lea.vmem (!%p481_p8), [#allocation2], %s1556_s4 }
  0x62   : > { %v1411_v8 = vld [vmem:[%s2165_s1 + $0x4] sm:$0xf]  ;;  %vm568_vm0 = vcmask 1043456   ;;  %v1430_v9 = vld [vmem:[%s2165_s1 + $0x8] sm:$0xf]  ;;  %vm543_vm1 = vcmask 31744  }
  0x63   : > { %1551 = vmatpush.msk.msra.mxu1 %vm568_vm0, %v1411_v8  ;;  %1552 = vmatpush.msk.msra.mxu2 %vm568_vm0, %v1411_v8  ;;  %v1448_v10 = vld [vmem:[%s2165_s1 + $0xc] sm:$0xf]  ;;  %v531_v11 = vld [vmem:[%s2165_s1] sm:$0xf]  ;;  %v1466_v12 = vld [vmem:[%s2165_s1 + $0x10] sm:$0xf] }
  0x64   : > { %1553 = vmatpush.msk.msra.mxu3 %vm568_vm0, %v1411_v8  ;;  %v1502_v13 = vld [vmem:[%s2165_s1 + $0x18] sm:$0xf]  ;;  %v1879_v14 = vld [vmem:[%s1876_s21 + $0xb0] sm:$0xff]  ;;  %1412 = vmatpush.msk.msra.mxu0 %vm568_vm0, %v1411_v8  ;;  %v1520_v18 = vld [vmem:[%s2165_s1 + $0x1c] sm:$0xf]  ;;  %s2175_s14 = smov (!%p518_p9, %s1628_s14), 1 }
  0x65   : > { %1431 = vmatpush.msk.msrb.mxu2 %vm568_vm0, %v1430_v9  ;;  %1421 = vmatpush.msk.msrb.mxu1 %vm568_vm0, %v531_v11  ;;  %v1882_v15 = vld [vmem:[%s1876_s21 + $0xd0] sm:$0xff]  ;;  %v1538_v20 = vld [vmem:[%s2165_s1 + $0x20] sm:$0xf]  ;;  %s1550_s28 = sshll.u32 %s2175_s14, 6 }
  0x66   : > { %1449 = vmatpush.msk.msrb.mxu3 %vm568_vm0, %v1448_v10  ;;  %v1885_v16 = vld [vmem:[%s1876_s21 + $0xf0] sm:$0xff]  ;;  %1415 = vmatmul.msk.f32.vlgmr.msra.gmra.mxu1 %vm543_vm1, %v1879_v14  ;;  %v1910_v21 = vld [vmem:[%s1876_s21 + $0xc0] sm:$0xff]  ;;  %s2101_s6 = scalar_lea.vmem %s2167_s3, %s1550_s28 }
  0x67   : > { %1417 = vmatmul.msk.f32.vlgmr.msra.gmra.mxu2 %vm543_vm1, %v1882_v15  ;;  %v1403_v17 = vld [vmem:[%s1876_s21 + $0x90] sm:$0xff]  ;;  %1419 = vmatmul.msk.f32.vlgmr.msra.gmra.mxu3 %vm543_vm1, %v1885_v16  ;;  %v1913_v22 = vld [vmem:[%s1876_s21 + $0xe0] sm:$0xff] }
  0x68   : > { %v1484_v19 = vld [vmem:[%s2165_s1 + $0x14] sm:$0xf]  ;;  %1413 = vmatmul.msk.f32.vlgmr.msra.gmra.mxu0 %vm543_vm1, %v1403_v17  ;;  %1503 = vmatpush.msk.msra.mxu2 %vm568_vm0, %v1502_v13  ;;  %v1917_v23 = vld [vmem:[%s1876_s21 + $0x100] sm:$0xff] }
  0x69   : > { %1467 = vmatpush.msk.msrb.mxu0 %vm568_vm0, %v1466_v12  ;;  %1521 = vmatpush.msk.msra.mxu3 %vm568_vm0, %v1520_v18  ;;  %v1920_v24 = vld [vmem:[%s1876_s21 + $0xa0] sm:$0xff]  ;;  %v1458_v28 = vld [vmem:[%s1876_s21 + $0x1b0] sm:$0xff] }
  0x6a   : > { %1485 = vmatpush.msk.msra.mxu1 %vm568_vm0, %v1484_v19  ;;  %v523_v25 = vld [vmem:[%s1876_s21] sm:$0xff]  ;;  %v524_v29 = vld [vmem:[%s1876_s21 + $0x10] sm:$0xff] }
  0x6b   : > { %1539 = vmatpush.msk.msra.mxu0 %vm568_vm0, %v1538_v20  ;;  %v681_v26 = vld [vmem:[%s1876_s21 + $0x1] sm:$0xff]  ;;  %v682_v30 = vld [vmem:[%s1876_s21 + $0x11] sm:$0xff] }
  0x6c   : > { %v1440_v27 = vld [vmem:[%s1876_s21 + $0x120] sm:$0xff]  ;;  %v1441_v31 = vld [vmem:[%s1876_s21 + $0x130] sm:$0xff] }
  0x6d   : > { %v1459_v32 = vld [vmem:[%s1876_s21 + $0x1c0] sm:$0xff]  ;;  %v1460_v36 = vld [vmem:[%s1876_s21 + $0x1d0] sm:$0xff] }
  0x6e   : > { %1416 = vmatmul.msk.f32.gmra.mxu1 %vm543_vm1, %v1910_v21  ;;  %v525_v33 = vld [vmem:[%s1876_s21 + $0x20] sm:$0xff]  ;;  %v526_v37 = vld [vmem:[%s1876_s21 + $0x30] sm:$0xff] }
  0x6f   : > { %1418 = vmatmul.msk.f32.gmra.mxu2 %vm543_vm1, %v1913_v22  ;;  %1420 = vmatmul.msk.f32.gmra.mxu3 %vm543_vm1, %v1917_v23  ;;  %v683_v34 = vld [vmem:[%s1876_s21 + $0x21] sm:$0xff]  ;;  %v684_v38 = vld [vmem:[%s1876_s21 + $0x31] sm:$0xff] }
  0x70   : > { %1414 = vmatmul.msk.f32.gmra.mxu0 %vm543_vm1, %v1920_v24  ;;  %v1442_v35 = vld [vmem:[%s1876_s21 + $0x140] sm:$0xff]  ;;  %v1443_v39 = vld [vmem:[%s1876_s21 + $0x150] sm:$0xff] }
  0x71   : > { %v1461_v40 = vld [vmem:[%s1876_s21 + $0x1e0] sm:$0xff]  ;;  %v1462_v44 = vld [vmem:[%s1876_s21 + $0x1f0] sm:$0xff] }
  0x72   : > { %v527_v41 = vld [vmem:[%s1876_s21 + $0x40] sm:$0xff]  ;;  %v528_v45 = vld [vmem:[%s1876_s21 + $0x50] sm:$0xff] }
  0x73   : > { %v685_v42 = vld [vmem:[%s1876_s21 + $0x41] sm:$0xff]  ;;  %v686_v46 = vld [vmem:[%s1876_s21 + $0x51] sm:$0xff] }
  0x74   : > { %v1444_v43 = vld [vmem:[%s1876_s21 + $0x160] sm:$0xff]  ;;  %v1445_v47 = vld [vmem:[%s1876_s21 + $0x170] sm:$0xff] }
  0x75   : > { %v1463_v48 = vld [vmem:[%s1876_s21 + $0x200] sm:$0xff]  ;;  %v1464_v52 = vld [vmem:[%s1876_s21 + $0x210] sm:$0xff] }
  0x76   : > { %1422 = vmatmul.msk.f32.vlgmr.msrb.gmra.mxu1 %vm543_vm1, %v523_v25  ;;  %v529_v49 = vld [vmem:[%s1876_s21 + $0x60] sm:$0xff]  ;;  %v530_v53 = vld [vmem:[%s1876_s21 + $0x70] sm:$0xff] }
  0x77   : > { %1432 = vmatmul.msk.f32.vlgmr.msrb.gmra.mxu2 %vm543_vm1, %v681_v26  ;;  %1450 = vmatmul.msk.f32.vlgmr.msrb.gmra.mxu3 %vm543_vm1, %v1440_v27  ;;  %v687_v50 = vld [vmem:[%s1876_s21 + $0x61] sm:$0xff]  ;;  %v688_v54 = vld [vmem:[%s1876_s21 + $0x71] sm:$0xff] }
  0x78   : > { %1468 = vmatmul.msk.f32.vlgmr.msrb.gmra.mxu0 %vm543_vm1, %v1458_v28  ;;  %v1446_v51 = vld [vmem:[%s1876_s21 + $0x180] sm:$0xff]  ;;  %v1447_v55 = vld [vmem:[%s1876_s21 + $0x190] sm:$0xff] }
  0x79   : > { %v1465_v56 = vld [vmem:[%s1876_s21 + $0x220] sm:$0xff]  ;;  %v1477_v58 = vld [vmem:[%s1876_s21 + $0x131] sm:$0xff] }
  0x7a   : > { %v1476_v57 = vld [vmem:[%s1876_s21 + $0x121] sm:$0xff]  ;;  %v1479_v60 = vld [vmem:[%s1876_s21 + $0x151] sm:$0xff] }
  0x7b   : > { %v1478_v59 = vld [vmem:[%s1876_s21 + $0x141] sm:$0xff]  ;;  %v1481_v62 = vld [vmem:[%s1876_s21 + $0x171] sm:$0xff] }
  0x7c   : > { %v1480_v61 = vld [vmem:[%s1876_s21 + $0x161] sm:$0xff]  ;;  %v1483_v5 = vld [vmem:[%s1876_s21 + $0x191] sm:$0xff] }
  0x7d   : > { %v1482_v0 = vld [vmem:[%s1876_s21 + $0x181] sm:$0xff]  ;;  %v1519_v7 = vld [vmem:[%s1876_s21 + $0x110] sm:$0xff] }
  0x7e   : > { %1423 = vmatmul.msk.f32.gmra.mxu1 %vm543_vm1, %v524_v29  ;;  %v1501_v6 = vld [vmem:[%s1876_s21 + $0x80] sm:$0xff] }
  0x7f   : > { %1433 = vmatmul.msk.f32.gmra.mxu2 %vm543_vm1, %v682_v30  ;;  %1451 = vmatmul.msk.f32.gmra.mxu3 %vm543_vm1, %v1441_v31  ;;  %v1537_v9 = vld [vmem:[%s1876_s21 + $0x81] sm:$0xff] }
  0x80   : > { %1469 = vmatmul.msk.f32.gmra.mxu0 %vm543_vm1, %v1459_v32 }
  0x86   : > { %1424 = vmatmul.msk.f32.gmra.mxu1 %vm543_vm1, %v525_v33 }
  0x87   : > { %1434 = vmatmul.msk.f32.gmra.mxu2 %vm543_vm1, %v683_v34  ;;  %1452 = vmatmul.msk.f32.gmra.mxu3 %vm543_vm1, %v1442_v35 }
  0x88   : > { %1470 = vmatmul.msk.f32.gmra.mxu0 %vm543_vm1, %v1460_v36 }
  0x8e   : > { %1425 = vmatmul.msk.f32.gmra.mxu1 %vm543_vm1, %v526_v37 }
  0x8f   : > { %1435 = vmatmul.msk.f32.gmra.mxu2 %vm543_vm1, %v684_v38  ;;  %1453 = vmatmul.msk.f32.gmra.mxu3 %vm543_vm1, %v1443_v39 }
  0x90   : > { %1471 = vmatmul.msk.f32.gmra.mxu0 %vm543_vm1, %v1461_v40 }
  0x96   : > { %1426 = vmatmul.msk.f32.gmra.mxu1 %vm543_vm1, %v527_v41 }
  0x97   : > { %1436 = vmatmul.msk.f32.gmra.mxu2 %vm543_vm1, %v685_v42  ;;  %1454 = vmatmul.msk.f32.gmra.mxu3 %vm543_vm1, %v1444_v43 }
  0x98   : > { %1472 = vmatmul.msk.f32.gmra.mxu0 %vm543_vm1, %v1462_v44 }
  0x9e   : > { %1427 = vmatmul.msk.f32.gmra.mxu1 %vm543_vm1, %v528_v45 }
  0x9f   : > { %1437 = vmatmul.msk.f32.gmra.mxu2 %vm543_vm1, %v686_v46  ;;  %1455 = vmatmul.msk.f32.gmra.mxu3 %vm543_vm1, %v1445_v47 }
  0xa0   : > { %1473 = vmatmul.msk.f32.gmra.mxu0 %vm543_vm1, %v1463_v48 }
  0xa6   : > { %1428 = vmatmul.msk.f32.gmra.mxu1 %vm543_vm1, %v529_v49 }
  0xa7   : > { %1438 = vmatmul.msk.f32.gmra.mxu2 %vm543_vm1, %v687_v50  ;;  %1456 = vmatmul.msk.f32.gmra.mxu3 %vm543_vm1, %v1446_v51 }
  0xa8   : > { %1474 = vmatmul.msk.f32.gmra.mxu0 %vm543_vm1, %v1464_v52 }
  0xae   : > { %1429 = vmatmul.msk.f32.gmra.mxu1 %vm543_vm1, %v530_v53 }
  0xaf   : > { %1439 = vmatmul.msk.f32.gmra.mxu2 %vm543_vm1, %v688_v54  ;;  %1457 = vmatmul.msk.f32.gmra.mxu3 %vm543_vm1, %v1447_v55 }
  0xb0   : > { %1475 = vmatmul.msk.f32.gmra.mxu0 %vm543_vm1, %v1465_v56 }
  0xb6   : > { %1486 = vmatmul.msk.f32.vlgmr.msra.gmra.mxu1 %vm543_vm1, %v1476_v57 }
  0xb7   : > { %1504 = vmatmul.msk.f32.vlgmr.msra.gmra.mxu2 %vm543_vm1, %v524_v29  ;;  %1522 = vmatmul.msk.f32.vlgmr.msra.gmra.mxu3 %vm543_vm1, %v1920_v24 }
  0xb8   : > { %1540 = vmatmul.msk.f32.vlgmr.msra.gmra.mxu0 %vm543_vm1, %v682_v30 }
  0xbe   : > { %1487 = vmatmul.msk.f32.gmra.mxu1 %vm543_vm1, %v1477_v58 }
  0xbf   : > { %1505 = vmatmul.msk.f32.gmra.mxu2 %vm543_vm1, %v525_v33  ;;  %1523 = vmatmul.msk.f32.gmra.mxu3 %vm543_vm1, %v1879_v14 }
  0xc0   : > { %1541 = vmatmul.msk.f32.gmra.mxu0 %vm543_vm1, %v683_v34 }
  0xc6   : > { %1488 = vmatmul.msk.f32.gmra.mxu1 %vm543_vm1, %v1478_v59 }
  0xc7   : > { %1506 = vmatmul.msk.f32.gmra.mxu2 %vm543_vm1, %v526_v37  ;;  %1524 = vmatmul.msk.f32.gmra.mxu3 %vm543_vm1, %v1910_v21 }
  0xc8   : > { %1542 = vmatmul.msk.f32.gmra.mxu0 %vm543_vm1, %v684_v38 }
  0xce   : > { %1489 = vmatmul.msk.f32.gmra.mxu1 %vm543_vm1, %v1479_v60  ;;  %v2096_v60 = vld [vmem:[%s2166_s2] ss:$0 sm:$0xff] }
  0xcf   : > { %1507 = vmatmul.msk.f32.gmra.mxu2 %vm543_vm1, %v527_v41  ;;  %1525 = vmatmul.msk.f32.gmra.mxu3 %vm543_vm1, %v1882_v15 }
  0xd0   : > { %1543 = vmatmul.msk.f32.gmra.mxu0 %vm543_vm1, %v685_v42 }
  0xd6   : > { %1490 = vmatmul.msk.f32.gmra.mxu1 %vm543_vm1, %v1480_v61 }
  0xd7   : > { %1508 = vmatmul.msk.f32.gmra.mxu2 %vm543_vm1, %v528_v45  ;;  %1526 = vmatmul.msk.f32.gmra.mxu3 %vm543_vm1, %v1913_v22 }
  0xd8   : > { %1544 = vmatmul.msk.f32.gmra.mxu0 %vm543_vm1, %v686_v46 }
  0xde   : > { %1491 = vmatmul.msk.f32.gmra.mxu1 %vm543_vm1, %v1481_v62 }
  0xdf   : > { %1509 = vmatmul.msk.f32.gmra.mxu2 %vm543_vm1, %v529_v49  ;;  %1527 = vmatmul.msk.f32.gmra.mxu3 %vm543_vm1, %v1885_v16 }
  0xe0   : > { %1545 = vmatmul.msk.f32.gmra.mxu0 %vm543_vm1, %v687_v50 }
  0xe3   : > { %v2030_v63 = vpop.f32.mrf.mxu1 }
  0xe5   : > { %v589_v1 = vpop.f32.mrf.mxu0 }
  0xe6   : > { %1492 = vmatmul.msk.f32.gmra.mxu1 %vm543_vm1, %v1482_v0 }
  0xe7   : > { %1510 = vmatmul.msk.f32.gmra.mxu2 %vm543_vm1, %v530_v53  ;;  %1528 = vmatmul.msk.f32.gmra.mxu3 %vm543_vm1, %v1917_v23 }
  0xe8   : > { %1546 = vmatmul.msk.f32.gmra.mxu0 %vm543_vm1, %v688_v54 }
  0xea   : > { %v2038_v2 = vpop.f32.mrf.mxu2  ;;  %v2040_v3 = vpop.f32.mrf.mxu3 }
  0xeb   : > { %v2042_v4 = vpop.f32.mrf.mxu1 }
  0xed   : > { %v592_v8 = vpop.f32.mrf.mxu0 }
  0xee   : > { %1493 = vmatmul.msk.f32.gmra.mxu1 %vm543_vm1, %v1483_v5 }
  0xef   : > { %1511 = vmatmul.msk.f32.gmra.mxu2 %vm543_vm1, %v1501_v6  ;;  %1529 = vmatmul.msk.f32.gmra.mxu3 %vm543_vm1, %v1519_v7 }
  0xf0   : > { %1547 = vmatmul.msk.f32.gmra.mxu0 %vm543_vm1, %v1537_v9 }
  0xf2   : > { %v2052_v10 = vpop.f32.mrf.mxu2  ;;  %v2054_v11 = vpop.f32.mrf.mxu3 }
  0xf3   : > { %v657_v12 = vpop.f32.mrf.mxu1 }
  0xf4   : > { %v658_v41 = vadd.f32 %v657_v12, %v589_v1 }
  0xf5   : > { %v909_v13 = vpop.f32.mrf.mxu0 }
  0xfa   : > { %v735_v14 = vpop.f32.mrf.mxu2  ;;  %v822_v15 = vpop.f32.mrf.mxu3 }
  0xfb   : > { %v660_v16 = vpop.f32.mrf.mxu1  ;;  %v759_v43 = vadd.f32 %v735_v14, %v658_v41 }
  0xfc   : > { %v661_v48 = vadd.f32 %v660_v16, %v592_v8 }
  0xfd   : > { %v912_v17 = vpop.f32.mrf.mxu0  ;;  %v846_v45 = vadd.f32 %v822_v15, %v759_v43 }
  0xff   : > { %v933_v50 = vadd.f32 %v909_v13, %v846_v45 }
 0x102   : > { %v738_v18 = vpop.f32.mrf.mxu2  ;;  %v825_v19 = vpop.f32.mrf.mxu3 }
 0x103   : > { %v663_v20 = vpop.f32.mrf.mxu1  ;;  %v760_v51 = vadd.f32 %v738_v18, %v661_v48 }
 0x104   : > { %v664_v58 = vadd.f32 %v663_v20, %v2030_v63 }
 0x105   : > { %v915_v21 = vpop.f32.mrf.mxu0  ;;  %v847_v54 = vadd.f32 %v825_v19, %v760_v51 }
 0x107   : > { %v934_v62 = vadd.f32 %v912_v17, %v847_v54 }
 0x10a   : > { %v741_v22 = vpop.f32.mrf.mxu2  ;;  %v828_v23 = vpop.f32.mrf.mxu3 }
 0x10b   : > { %v666_v24 = vpop.f32.mrf.mxu1  ;;  %v761_v0 = vadd.f32 %v741_v22, %v664_v58 }
 0x10c   : > { %v667_v13 = vadd.f32 %v666_v24, %v2042_v4 }
 0x10d   : > { %v2056_v25 = vpop.f32.mrf.mxu0  ;;  %v848_v7 = vadd.f32 %v828_v23, %v761_v0 }
 0x10f   : > { %v935_v16 = vadd.f32 %v915_v21, %v848_v7 }
 0x112   : > { %v744_v26 = vpop.f32.mrf.mxu2  ;;  %v831_v27 = vpop.f32.mrf.mxu3 }
 0x113   : > { %v2058_v28 = vpop.f32.mrf.mxu1  ;;  %v762_v17 = vadd.f32 %v744_v26, %v667_v13 }
 0x115   : > { %v2060_v29 = vpop.f32.mrf.mxu0  ;;  %v849_v41 = vadd.f32 %v831_v27, %v762_v17 }
 0x117   : > { %v936_v21 = vadd.f32 %v2056_v25, %v849_v41 }
 0x11a   : > { %v2062_v30 = vpop.f32.mrf.mxu2  ;;  %v2064_v31 = vpop.f32.mrf.mxu3 }
 0x11b   : > { %v2066_v32 = vpop.f32.mrf.mxu1 }
 0x11d   : > { %v2068_v33 = vpop.f32.mrf.mxu0 }
 0x122   : > { %v2070_v34 = vpop.f32.mrf.mxu2  ;;  %v2072_v35 = vpop.f32.mrf.mxu3 }
 0x123   : > { %v2074_v36 = vpop.f32.mrf.mxu1 }
 0x125   : > { %v2076_v37 = vpop.f32.mrf.mxu0 }
 0x12a   : > { %v2078_v38 = vpop.f32.mrf.mxu2  ;;  %v2080_v39 = vpop.f32.mrf.mxu3 }
 0x12b   : > { %v2082_v40 = vpop.f32.mrf.mxu1 }
 0x12d   : > { %v2084_v42 = vpop.f32.mrf.mxu0 }
 0x132   : > { %v2086_v44 = vpop.f32.mrf.mxu2  ;;  %v2088_v46 = vpop.f32.mrf.mxu3 }
 0x133   : > { %v995_v47 = vpop.f32.mrf.mxu1 }
 0x134   : > { %v1019_v52 = vadd.f32 %v995_v47, %v933_v50  ;;  %v670_v47 = vadd.f32 %v2058_v28, %v2038_v2  ;;  %v673_v2 = vadd.f32 %v2066_v32, %v2052_v10  ;;  %v676_v10 = vadd.f32 %v2074_v36, %v2040_v3 }
 0x135   : > { %v1255_v49 = vpop.f32.mrf.mxu0  ;;  %v679_v3 = vadd.f32 %v2082_v40, %v2054_v11 }
 0x136   : > { %v763_v26 = vadd.f32 %v2062_v30, %v670_v47 }
 0x138   : > { %v850_v27 = vadd.f32 %v2064_v31, %v763_v26 }
 0x13a   : > { %v1082_v53 = vpop.f32.mrf.mxu2  ;;  %v1169_v56 = vpop.f32.mrf.mxu3  ;;  %v937_v30 = vadd.f32 %v2060_v29, %v850_v27 }
 0x13b   : > { %v1106_v55 = vadd.f32 %v1082_v53, %v1019_v52  ;;  %v998_v57 = vpop.f32.mrf.mxu1 }
 0x13c   : > { %v1020_v5 = vadd.f32 %v998_v57, %v934_v62 }
 0x13d   : > { %v1193_v59 = vadd.f32 %v1169_v56, %v1106_v55  ;;  %v1258_v61 = vpop.f32.mrf.mxu0  ;;  %v764_v55 = vadd.f32 %v2070_v34, %v673_v2  ;;  %v765_v34 = vadd.f32 %v2078_v38, %v676_v10  ;;  %v766_v38 = vadd.f32 %v2086_v44, %v679_v3 }
 0x13f   : > { %v1279_v1 = vadd.f32 %v1255_v49, %v1193_v59  ;;  %v851_v31 = vadd.f32 %v2072_v35, %v764_v55  ;;  %v852_v35 = vadd.f32 %v2080_v39, %v765_v34  ;;  %v853_v17 = vadd.f32 %v2088_v46, %v766_v38 }
 0x141   : > { %v1291_v63 = vadd.f32 %v2096_v60, %v1279_v1  ;;  %v938_v29 = vadd.f32 %v2068_v33, %v851_v31  ;;  %v939_v36 = vadd.f32 %v2076_v37, %v852_v35  ;;  %v940_v37 = vadd.f32 %v2084_v42, %v853_v17 }
 0x142   : > { %v1085_v6 = vpop.f32.mrf.mxu2  ;;  %v1172_v9 = vpop.f32.mrf.mxu3 }
 0x143   : > { %1299 = vst.msk [vmem:[%s2101_s6] sm:$0xff] %vm543_vm1, %v1291_v63  ;;  %v1107_v8 = vadd.f32 %v1085_v6, %v1020_v5  ;;  %v1001_v12 = vpop.f32.mrf.mxu1 }
 0x144   : > { %v1021_v19 = vadd.f32 %v1001_v12, %v935_v16 }
 0x145   : > { %v1194_v14 = vadd.f32 %v1172_v9, %v1107_v8  ;;  %v1261_v15 = vpop.f32.mrf.mxu0 }
 0x147   : > { %v1280_v18 = vadd.f32 %v1258_v61, %v1194_v14 }
 0x149   : > { %v1292_v20 = vadd.f32 %v2096_v60, %v1280_v18 }
 0x14a   : > { %v1088_v22 = vpop.f32.mrf.mxu2  ;;  %v1175_v43 = vpop.f32.mrf.mxu3 }
 0x14b   : > { %1300 = vst.msk [vmem:[%s2101_s6 + $0x8] sm:$0xff] %vm543_vm1, %v1292_v20  ;;  %v1108_v23 = vadd.f32 %v1088_v22, %v1021_v19  ;;  %v1004_v45 = vpop.f32.mrf.mxu1 }
 0x14c   : > { %v1022_v49 = vadd.f32 %v1004_v45, %v936_v21 }
 0x14d   : > { %v1195_v4 = vadd.f32 %v1175_v43, %v1108_v23  ;;  %v1264_v24 = vpop.f32.mrf.mxu0 }
 0x14f   : > { %v1281_v48 = vadd.f32 %v1261_v15, %v1195_v4 }
 0x151   : > { %v1293_v50 = vadd.f32 %v2096_v60, %v1281_v48 }
 0x152   : > { %v1091_v51 = vpop.f32.mrf.mxu2  ;;  %v1178_v53 = vpop.f32.mrf.mxu3 }
 0x153   : > { %1301 = vst.msk [vmem:[%s2101_s6 + $0x10] sm:$0xff] %vm543_vm1, %v1293_v50  ;;  %v1109_v52 = vadd.f32 %v1091_v51, %v1022_v49  ;;  %v1007_v54 = vpop.f32.mrf.mxu1 }
 0x154   : > { %v1023_v57 = vadd.f32 %v1007_v54, %v937_v30 }
 0x155   : > { %v1196_v28 = vadd.f32 %v1178_v53, %v1109_v52  ;;  %v1267_v25 = vpop.f32.mrf.mxu0 }
 0x157   : > { %v1282_v56 = vadd.f32 %v1264_v24, %v1196_v28 }
 0x159   : > { %v1294_v58 = vadd.f32 %v2096_v60, %v1282_v56 }
 0x15a   : > { %v1094_v59 = vpop.f32.mrf.mxu2  ;;  %v1181_v62 = vpop.f32.mrf.mxu3 }
 0x15b   : > { %1302 = vst.msk [vmem:[%s2101_s6 + $0x18] sm:$0xff] %vm543_vm1, %v1294_v58  ;;  %v1110_v61 = vadd.f32 %v1094_v59, %v1023_v57  ;;  %v1010_v0 = vpop.f32.mrf.mxu1 }
 0x15c   : > { %v1024_v63 = vadd.f32 %v1010_v0, %v938_v29 }
 0x15d   : > { %v1197_v32 = vadd.f32 %v1181_v62, %v1110_v61  ;;  %v1270_v5 = vpop.f32.mrf.mxu0 }
 0x15f   : > { %v1283_v1 = vadd.f32 %v1267_v25, %v1197_v32 }
 0x161   : > { %v1295_v6 = vadd.f32 %v2096_v60, %v1283_v1 }
 0x162   : > { %v1097_v7 = vpop.f32.mrf.mxu2  ;;  %v1184_v9 = vpop.f32.mrf.mxu3 }
 0x163   : > { %1303 = vst.msk [vmem:[%s2101_s6 + $0x20] sm:$0xff] %vm543_vm1, %v1295_v6  ;;  %v1111_v8 = vadd.f32 %v1097_v7, %v1024_v63  ;;  %v1013_v12 = vpop.f32.mrf.mxu1 }
 0x164   : > { %v1025_v14 = vadd.f32 %v1013_v12, %v939_v36 }
 0x165   : > { %v1198_v33 = vadd.f32 %v1184_v9, %v1111_v8  ;;  %v1273_v39 = vpop.f32.mrf.mxu0 }
 0x167   : > { %v1284_v13 = vadd.f32 %v1270_v5, %v1198_v33 }
 0x169   : > { %v1296_v15 = vadd.f32 %v2096_v60, %v1284_v13 }
 0x16a   : > { %v1100_v16 = vpop.f32.mrf.mxu2  ;;  %v1187_v19 = vpop.f32.mrf.mxu3 }
 0x16b   : > { %1304 = vst.msk [vmem:[%s2101_s6 + $0x28] sm:$0xff] %vm543_vm1, %v1296_v15  ;;  %v1112_v18 = vadd.f32 %v1100_v16, %v1025_v14  ;;  %v1016_v40 = vpop.f32.mrf.mxu1 }
 0x16c   : > { %v1026_v44 = vadd.f32 %v1016_v40, %v940_v37 }
 0x16d   : > { %v1199_v11 = vadd.f32 %v1187_v19, %v1112_v18  ;;  %v1276_v45 = vpop.f32.mrf.mxu0 }
 0x16f   : > { %v1285_v20 = vadd.f32 %v1273_v39, %v1199_v11 }
 0x171   : > { %v1297_v22 = vadd.f32 %v2096_v60, %v1285_v20 }
 0x172   : > { %v1103_v41 = vpop.f32.mrf.mxu2  ;;  %v1190_v43 = vpop.f32.mrf.mxu3 }
 0x173   : > { %1305 = vst.msk [vmem:[%s2101_s6 + $0x30] sm:$0xff] %vm543_vm1, %v1297_v22  ;;  %v1113_v23 = vadd.f32 %v1103_v41, %v1026_v44 }
 0x175   : > { %v1200_v46 = vadd.f32 %v1190_v43, %v1113_v23 }
 0x177   : > { %v1286_v47 = vadd.f32 %v1276_v45, %v1200_v46 }
 0x179   : > { %v1298_v4 = vadd.f32 %v2096_v60, %v1286_v47 }
 0x17b   : > { %1306 = vst.msk [vmem:[%s2101_s6 + $0x38] sm:$0xff] %vm543_vm1, %v1298_v4 }
 0x17c PF: > { %s13_s16 = sadd.s32 1, %s1636_s16   ;;  %s2168_s12 = smov %s1624_s13 }
 0x17d   : > { %p10_p10 = scmp.ge.s32.totalorder %s13_s16, 4   ;;  %s2169_s13 = smov %s1693_s20 }
 0x17e   : > { %s2170_s14 = smov %s1632_s15  ;;  %s2171_s15 = smov %s2173_s17 }
 0x17f   :  { %12 = sbr.rel (!%p10_p10) target bundleno = 3 (0x3), region = 121 }

</bundles_post_ra>
